<compile_context>
chip_gen: v6e
topology: v6e:2x2x1
jax: 0.10.0
libtpu: 0.0.40
codegen_flags: <defaults>
</compile_context>

<pallas_src>
import jax
import jax.numpy as jnp
from jax.experimental import pallas as pl
from jax.experimental.pallas import tpu as pltpu


def _parallel_computing_kernel(mat_ref, x_ref, dfT_ref, df_ref,
                               red_x_ref, red_c_ref, f1_ref, f2_ref):
    """Row-tiled kernel.

    mat_ref   : (TILE_N, D)  f32   nonzero => disease connected to x
    x_ref     : (TILE_N, F)  f32
    dfT_ref   : (F, D)       bf16  (disease_feature @ dim_transform)^T
    df_ref    : (D, F)       bf16   disease_feature @ dim_transform
    red_x_ref : (F, F)       bf16   dim_reduction_mat[:F]
    red_c_ref : (F, F)       bf16   dim_reduction_mat[F:]
    f1_ref    : (TILE_N, F)  f32
    f2_ref    : (TILE_N, F)  f32
    """
    x = x_ref[...]                                          # (T, F) f32
    mask = (mat_ref[...] != 0.0).astype(jnp.float32)        # (T, D) binary
    x_bf = x.astype(jnp.bfloat16)

    # attention_coefficient: att_n = mask_n * (df @ x_n)
    s = jnp.dot(x_bf, dfT_ref[...],
                preferred_element_type=jnp.float32)         # (T, D) f32
    att = (mask * s).astype(jnp.bfloat16)                   # (T, D)

    # disease_contribution = att @ (diag(mask) @ df) == att @ df (mask binary,
    # att already masked)
    contrib = jnp.dot(att, df_ref[...],
                      preferred_element_type=jnp.float32)   # (T, F) f32

    # x_feature_1 = x^T + contribution
    f1_ref[...] = x + contrib

    # x_feature_2 = cat(x^T, contribution) @ dim_reduction_mat
    f2_ref[...] = (
        jnp.dot(x_bf, red_x_ref[...], preferred_element_type=jnp.float32)
        + jnp.dot(contrib.astype(jnp.bfloat16), red_c_ref[...],
                  preferred_element_type=jnp.float32))


def parallel_computing_forward(mat_x_disease, x_features, disease_feature_proc,
                               disease_dimension_transform, dim_reduction_mat,
                               *, tile_n=128):
    """Returns (N_sel, 1, 2F) float32, matching the PyTorch module output."""
    N, D = mat_x_disease.shape
    F = x_features.shape[1]

    # Hoisted item-invariant matmul (f32), then bf16 for the kernel's MXU ops.
    df = (disease_feature_proc @ disease_dimension_transform)   # (D, F) f32
    df_bf = df.astype(jnp.bfloat16)
    dfT_bf = df_bf.T                                             # (F, D)
    red_x = dim_reduction_mat[:F, :].astype(jnp.bfloat16)        # (F, F)
    red_c = dim_reduction_mat[F:, :].astype(jnp.bfloat16)        # (F, F)

    # Pad N to a full row tile so the MXU M-dim is >= one tile and BlockSpecs
    # stay (8,128)-legal once this is scaled to real N.
    n_tiles = pl.cdiv(N, tile_n)
    n_pad = n_tiles * tile_n
    mat_p = jnp.zeros((n_pad, D), jnp.float32).at[:N].set(
        mat_x_disease.astype(jnp.float32))
    x_p = jnp.zeros((n_pad, F), jnp.float32).at[:N].set(
        x_features.astype(jnp.float32))

    cost = pl.CostEstimate(
        flops=int(n_pad * (4 * D * F + 4 * F * F)),
        transcendentals=0,
        bytes_accessed=int(4 * n_pad * (D + F)            # mat, x in
                           + 2 * (2 * D * F + 2 * F * F)  # df, dfT, red_x/c
                           + 4 * 2 * n_pad * F))          # f1, f2 out

    f1, f2 = pl.pallas_call(
        _parallel_computing_kernel,
        out_shape=(jax.ShapeDtypeStruct((n_pad, F), jnp.float32),
                   jax.ShapeDtypeStruct((n_pad, F), jnp.float32)),
        grid=(n_tiles,),
        in_specs=[
            pl.BlockSpec((tile_n, D), lambda i: (i, 0)),
            pl.BlockSpec((tile_n, F), lambda i: (i, 0)),
            pl.BlockSpec((F, D), lambda i: (0, 0)),
            pl.BlockSpec((D, F), lambda i: (0, 0)),
            pl.BlockSpec((F, F), lambda i: (0, 0)),
            pl.BlockSpec((F, F), lambda i: (0, 0)),
        ],
        out_specs=(pl.BlockSpec((tile_n, F), lambda i: (i, 0)),
                   pl.BlockSpec((tile_n, F), lambda i: (i, 0))),
        compiler_params=pltpu.CompilerParams(
            dimension_semantics=("parallel",)),
        cost_estimate=cost,
    )(mat_p, x_p, dfT_bf, df_bf, red_x, red_c)

    out = jnp.concatenate([f1[:N], f2[:N]], axis=1)   # (N, 2F), cheap XLA
    return out.reshape(N, 1, 2 * F)


def _xavier_normal(key, shape):
    fan_in, fan_out = shape
    std = (2.0 / (fan_in + fan_out)) ** 0.5
    return std * jax.random.normal(key, shape, dtype=jnp.float32)


def _reference_forward_f32(mat, x, dfeat, dimtrans, red):
    """Pure-f32 JAX reference mirroring the PyTorch per-item loop (vectorized)."""
    F = x.shape[1]
    mask = (mat != 0.0).astype(jnp.float32)
    df = dfeat @ dimtrans
    att = mask * (x @ df.T)
    contrib = att @ df
    f1 = x + contrib
    f2 = jnp.concatenate([x, contrib], axis=1) @ red
    return jnp.concatenate([f1, f2], axis=1)[:, None, :]


def _reference_forward_bf16(mat, x, dfeat, dimtrans, red):
    """Reference with the same bf16-operand / f32-accumulate numerics as the kernel."""
    F = x.shape[1]
    mask = (mat != 0.0).astype(jnp.float32)
    df = (dfeat @ dimtrans).astype(jnp.bfloat16)
    x_bf = x.astype(jnp.bfloat16)
    s = jnp.dot(x_bf, df.T, preferred_element_type=jnp.float32)
    att = (mask * s).astype(jnp.bfloat16)
    contrib = jnp.dot(att, df, preferred_element_type=jnp.float32)
    f1 = x + contrib
    red_bf = red.astype(jnp.bfloat16)
    f2 = (jnp.dot(x_bf, red_bf[:F], preferred_element_type=jnp.float32)
          + jnp.dot(contrib.astype(jnp.bfloat16), red_bf[F:],
                    preferred_element_type=jnp.float32))
    return jnp.concatenate([f1, f2], axis=1)[:, None, :]


if __name__ == "__main__":
    key = jax.random.PRNGKey(0)
    k_df, k_tr, k_dt, k_rd, k_mx, k_xf = jax.random.split(key, 6)

    # Small, module-consistent sizes.
    n_diseases = 8            # D
    disease_in_channels = 16
    disease_out_channels = 8
    x_features_dim = 32       # F
    n_x_total = 10
    x_indexes = jnp.array([3, 1, 4, 0, 5, 2], dtype=jnp.int32)   # 6 selected
    n_sel = int(x_indexes.shape[0])

    # Deterministic "loaded" data + xavier-initialized parameters.
    disease_feature_raw = jax.random.normal(
        k_df, (n_diseases, disease_in_channels), dtype=jnp.float32)
    dis_trans = _xavier_normal(k_tr, (disease_in_channels, disease_out_channels))
    disease_dimension_transform = _xavier_normal(
        k_dt, (disease_out_channels, x_features_dim))
    dim_reduction_mat = _xavier_normal(
        k_rd, (x_features_dim * 2, x_features_dim))
    mat_x_disease = jax.random.bernoulli(
        k_mx, 0.4, (n_x_total, n_diseases)).astype(jnp.float32)
    x_features = jax.random.normal(
        k_xf, (n_x_total, x_features_dim), dtype=jnp.float32)

    # init-time: disease_feature_processing()
    disease_feature_proc = disease_feature_raw @ dis_trans   # (D, C_out)

    # Reproduce the original indexing behaviour: forward uses loop positions
    # 0..n_sel-1 of x_features / mat_x_disease, regardless of x_indexes values.
    mat_sel = mat_x_disease[:n_sel]
    x_sel = x_features[:n_sel]

    out = parallel_computing_forward(
        mat_sel, x_sel, disease_feature_proc,
        disease_dimension_transform, dim_reduction_mat)
    out = jax.block_until_ready(out)

    assert out.shape == (n_sel, 1, 2 * x_features_dim)

    # Tight check against a reference with identical bf16/f32 numerics.
    ref_bf16 = _reference_forward_bf16(
        mat_sel, x_sel, disease_feature_proc,
        disease_dimension_transform, dim_reduction_mat)
    assert jnp.allclose(out, ref_bf16, atol=2e-3, rtol=2e-3)

    # Loose fidelity check against the pure-f32 module semantics (bf16 matmul
    # operands introduce only quantization-level differences).
    ref_f32 = _reference_forward_f32(
        mat_sel, x_sel, disease_feature_proc,
        disease_dimension_transform, dim_reduction_mat)
    assert jnp.allclose(out, ref_f32, atol=0.5, rtol=0.1)

    # TODO(synk): self.disease_fc (nn.Linear) is declared in __init__ but never
    # used in forward, so it is intentionally omitted.
    print("KERNEL_OK")
</pallas_src>

<mosaic_0001>
module attributes {stable_mosaic.version = 11 : i64} {
  func.func @_parallel_computing_kernel(%arg0: i32, %arg1: memref<128x8xf32, #tpu.memory_space<vmem>>, %arg2: memref<128x32xf32, #tpu.memory_space<vmem>>, %arg3: memref<32x8xbf16, #tpu.memory_space<vmem>>, %arg4: memref<8x32xbf16, #tpu.memory_space<vmem>>, %arg5: memref<32x32xbf16, #tpu.memory_space<vmem>>, %arg6: memref<32x32xbf16, #tpu.memory_space<vmem>>, %arg7: memref<128x32xf32, #tpu.memory_space<vmem>>, %arg8: memref<128x32xf32, #tpu.memory_space<vmem>>) attributes {dimension_semantics = [#tpu.dimension_semantics<parallel>], iteration_bounds = array<i64: 1>, scalar_prefetch = 0 : i64, scratch_operands = 0 : i64, tpu.core_type = #tpu.core_type<tc>, window_params = [{transform_indices = @transform_0, window_bounds = array<i64: 128, 8>}, {transform_indices = @transform_1, window_bounds = array<i64: 128, 32>}, {pipeline_mode = #tpu.pipeline_mode<synchronous>, transform_indices = @transform_2, window_bounds = array<i64: 32, 8>}, {pipeline_mode = #tpu.pipeline_mode<synchronous>, transform_indices = @transform_3, window_bounds = array<i64: 8, 32>}, {pipeline_mode = #tpu.pipeline_mode<synchronous>, transform_indices = @transform_4, window_bounds = array<i64: 32, 32>}, {pipeline_mode = #tpu.pipeline_mode<synchronous>, transform_indices = @transform_5, window_bounds = array<i64: 32, 32>}, {transform_indices = @transform_6, window_bounds = array<i64: 128, 32>}, {transform_indices = @transform_7, window_bounds = array<i64: 128, 32>}]} {
    %c0 = arith.constant 0 : index
    %c0_0 = arith.constant 0 : index
    %0 = vector.load %arg2[%c0, %c0_0] : memref<128x32xf32, #tpu.memory_space<vmem>>, vector<128x32xf32>
    %c0_1 = arith.constant 0 : index
    %c0_2 = arith.constant 0 : index
    %1 = vector.load %arg1[%c0_1, %c0_2] : memref<128x8xf32, #tpu.memory_space<vmem>>, vector<128x8xf32>
    %cst = arith.constant 0.000000e+00 : f32
    %2 = vector.broadcast %cst : f32 to vector<128x8xf32>
    %3 = arith.cmpf one, %1, %2 : vector<128x8xf32>
    %4 = arith.extui %3 : vector<128x8xi1> to vector<128x8xi32>
    %5 = arith.sitofp %4 : vector<128x8xi32> to vector<128x8xf32>
    %6 = arith.truncf %0 : vector<128x32xf32> to vector<128x32xbf16>
    %c0_3 = arith.constant 0 : index
    %c0_4 = arith.constant 0 : index
    %7 = vector.load %arg3[%c0_3, %c0_4] : memref<32x8xbf16, #tpu.memory_space<vmem>>, vector<32x8xbf16>
    %cst_5 = arith.constant dense<0.000000e+00> : vector<128x8xf32>
    %8 = tpu.matmul %6, %7, %cst_5 {dimension_numbers = #tpu.dot_dimension_numbers<[1], [0], [0], [1], [0, 0, 1, 1], [], []>} : vector<128x32xbf16>, vector<32x8xbf16>, vector<128x8xf32> -> vector<128x8xf32>
    %9 = arith.mulf %5, %8 : vector<128x8xf32>
    %10 = arith.truncf %9 : vector<128x8xf32> to vector<128x8xbf16>
    %c0_6 = arith.constant 0 : index
    %c0_7 = arith.constant 0 : index
    %11 = vector.load %arg4[%c0_6, %c0_7] : memref<8x32xbf16, #tpu.memory_space<vmem>>, vector<8x32xbf16>
    %cst_8 = arith.constant dense<0.000000e+00> : vector<128x32xf32>
    %12 = tpu.matmul %10, %11, %cst_8 {dimension_numbers = #tpu.dot_dimension_numbers<[1], [0], [0], [1], [0, 0, 1, 1], [], []>} : vector<128x8xbf16>, vector<8x32xbf16>, vector<128x32xf32> -> vector<128x32xf32>
    %13 = arith.addf %0, %12 : vector<128x32xf32>
    %c0_9 = arith.constant 0 : index
    %c0_10 = arith.constant 0 : index
    %14 = vector.load %arg7[%c0_9, %c0_10] : memref<128x32xf32, #tpu.memory_space<vmem>>, vector<128x32xf32>
    tpu.vector_store %arg7[%c0_9, %c0_10], %13 {strides = array<i32>} : memref<128x32xf32, #tpu.memory_space<vmem>>, vector<128x32xf32>,
    %c0_11 = arith.constant 0 : index
    %c0_12 = arith.constant 0 : index
    %15 = vector.load %arg5[%c0_11, %c0_12] : memref<32x32xbf16, #tpu.memory_space<vmem>>, vector<32x32xbf16>
    %cst_13 = arith.constant dense<0.000000e+00> : vector<128x32xf32>
    %16 = tpu.matmul %6, %15, %cst_13 {dimension_numbers = #tpu.dot_dimension_numbers<[1], [0], [0], [1], [0, 0, 1, 1], [], []>} : vector<128x32xbf16>, vector<32x32xbf16>, vector<128x32xf32> -> vector<128x32xf32>
    %17 = arith.truncf %12 : vector<128x32xf32> to vector<128x32xbf16>
    %c0_14 = arith.constant 0 : index
    %c0_15 = arith.constant 0 : index
    %18 = vector.load %arg6[%c0_14, %c0_15] : memref<32x32xbf16, #tpu.memory_space<vmem>>, vector<32x32xbf16>
    %cst_16 = arith.constant dense<0.000000e+00> : vector<128x32xf32>
    %19 = tpu.matmul %17, %18, %cst_16 {dimension_numbers = #tpu.dot_dimension_numbers<[1], [0], [0], [1], [0, 0, 1, 1], [], []>} : vector<128x32xbf16>, vector<32x32xbf16>, vector<128x32xf32> -> vector<128x32xf32>
    %20 = arith.addf %16, %19 : vector<128x32xf32>
    %c0_17 = arith.constant 0 : index
    %c0_18 = arith.constant 0 : index
    %21 = vector.load %arg8[%c0_17, %c0_18] : memref<128x32xf32, #tpu.memory_space<vmem>>, vector<128x32xf32>
    tpu.vector_store %arg8[%c0_17, %c0_18], %20 {strides = array<i32>} : memref<128x32xf32, #tpu.memory_space<vmem>>, vector<128x32xf32>,
    return
  }
  func.func @transform_0(%arg0: i32) -> (i32, i32) {
    %c0_i32 = arith.constant 0 : i32
    %c0_i32_0 = arith.constant 0 : i32
    return %arg0, %c0_i32 : i32, i32
  }
  func.func @transform_1(%arg0: i32) -> (i32, i32) {
    %c0_i32 = arith.constant 0 : i32
    %c0_i32_0 = arith.constant 0 : i32
    return %arg0, %c0_i32 : i32, i32
  }
  func.func @transform_2(%arg0: i32) -> (i32, i32) {
    %c0_i32 = arith.constant 0 : i32
    %c0_i32_0 = arith.constant 0 : i32
    %c0_i32_1 = arith.constant 0 : i32
    return %c0_i32, %c0_i32_0 : i32, i32
  }
  func.func @transform_3(%arg0: i32) -> (i32, i32) {
    %c0_i32 = arith.constant 0 : i32
    %c0_i32_0 = arith.constant 0 : i32
    %c0_i32_1 = arith.constant 0 : i32
    return %c0_i32, %c0_i32_0 : i32, i32
  }
  func.func @transform_4(%arg0: i32) -> (i32, i32) {
    %c0_i32 = arith.constant 0 : i32
    %c0_i32_0 = arith.constant 0 : i32
    %c0_i32_1 = arith.constant 0 : i32
    return %c0_i32, %c0_i32_0 : i32, i32
  }
  func.func @transform_5(%arg0: i32) -> (i32, i32) {
    %c0_i32 = arith.constant 0 : i32
    %c0_i32_0 = arith.constant 0 : i32
    %c0_i32_1 = arith.constant 0 : i32
    return %c0_i32, %c0_i32_0 : i32, i32
  }
  func.func @transform_6(%arg0: i32) -> (i32, i32) {
    %c0_i32 = arith.constant 0 : i32
    %c0_i32_0 = arith.constant 0 : i32
    return %arg0, %c0_i32 : i32, i32
  }
  func.func @transform_7(%arg0: i32) -> (i32, i32) {
    %c0_i32 = arith.constant 0 : i32
    %c0_i32_0 = arith.constant 0 : i32
    return %arg0, %c0_i32 : i32, i32
  }
}

</mosaic_0001>

<bundles_post_ra>
// kernel: tpu_custom_call.1
= control target key start
LH: loop header
LB: loop body
LE: loop exit
PB: predicated region body
PF: predicated region fallthrough
CT: control target
= control target key end

     0   :  { %vm130_vm0 = vcmask 261120   ;;  %vm302_vm1 = vcmask 1043456   ;;  %v896_v37 = vmov 0.0   ;;  %vm277_vm6 = vcmask 64512   ;;  %s1294_s2 = inlined_call_operand.vmem [shape: bf16[32,8], index: 2, kind: input, shape index: {}]   ;;  %s1295_s1 = inlined_call_operand.vmem [shape: f32[128,32], index: 1, kind: input, shape index: {}]   ;;  %s1296_s3 = inlined_call_operand.vmem [shape: bf16[8,32], index: 3, kind: input, shape index: {}]   ;;  %s1297_s5 = inlined_call_operand.vmem [shape: bf16[32,32], index: 5, kind: input, shape index: {}]   ;;  %s1298_s4 = inlined_call_operand.vmem [shape: bf16[32,32], index: 4, kind: input, shape index: {}]   ;;  %s1299_s0 = inlined_call_operand.vmem [shape: f32[128,8], index: 0, kind: input, shape index: {}]   ;;  %s1300_s6 = inlined_call_operand.vmem [shape: f32[128,32], index: 6, kind: output, shape index: {0}]   ;;  %s1301_s7 = inlined_call_operand.vmem [shape: f32[128,32], index: 7, kind: output, shape index: {1}]  }
   0x1   :  { %v890_v0 = vld [vmem:[%s1294_s2 + $0x8] sm:$0xff]   ;;  %v891_v1 = vld [vmem:[%s1294_s2] sm:$0xff]   ;;  %v958_v5 = vld [vmem:[%s1295_s1 + $0x10] sm:$0xff] }
   0x2   :  { %810 = vmatprep.subr.bf16.mxu0 %v890_v0  ;;  %v946_v2 = vld [vmem:[%s1295_s1] sm:$0xff]  ;;  %v951_v3 = vld [vmem:[%s1295_s1 + $0x8] sm:$0xff]  ;;  %v963_v6 = vld [vmem:[%s1295_s1 + $0x18] sm:$0xff] }
   0x3   :  { %811 = vmatpush3.bf16.msra.mxu0 %v890_v0  ;;  %v106_v4 = vpack.c.bf16 %v951_v3, %v946_v2  ;;  %v968_v7 = vld [vmem:[%s1295_s1 + $0x20] sm:$0xff]  ;;  %v973_v8 = vld [vmem:[%s1295_s1 + $0x28] sm:$0xff]  ;;  %v107_v9 = vpack.c.bf16 %v963_v6, %v958_v5  ;;  %v985_v11 = vld [vmem:[%s1295_s1 + $0x30] sm:$0xff] }
   0x4   :  { %812 = vmatprep.subr.bf16.mxu0 %v891_v1  ;;  %v108_v10 = vpack.c.bf16 %v973_v8, %v968_v7  ;;  %v990_v12 = vld [vmem:[%s1295_s1 + $0x38] sm:$0xff]  ;;  %v995_v13 = vld [vmem:[%s1295_s1 + $0x40] sm:$0xff]  ;;  %v1000_v14 = vld [vmem:[%s1295_s1 + $0x48] sm:$0xff] }
   0x5   :  { %814 = vmatprep.mubr.msk.bf16.mxu0 %vm130_vm0, %v106_v4  ;;  %v109_v15 = vpack.c.bf16 %v990_v12, %v985_v11  ;;  %v110_v16 = vpack.c.bf16 %v1000_v14, %v995_v13  ;;  %v1011_v17 = vld [vmem:[%s1295_s1 + $0x50] sm:$0xff]  ;;  %v1016_v18 = vld [vmem:[%s1295_s1 + $0x58] sm:$0xff]  ;;  %v1021_v19 = vld [vmem:[%s1295_s1 + $0x60] sm:$0xff] }
   0x6   :  { %v1026_v20 = vld [vmem:[%s1295_s1 + $0x68] sm:$0xff]  ;;  %v111_v21 = vpack.c.bf16 %v1016_v18, %v1011_v17  ;;  %v1037_v23 = vld [vmem:[%s1295_s1 + $0x70] sm:$0xff]  ;;  %v1042_v24 = vld [vmem:[%s1295_s1 + $0x78] sm:$0xff] }
   0x7   :  { %813 = vmatpush3.bf16.msra.mxu0 %v891_v1  ;;  %v112_v22 = vpack.c.bf16 %v1026_v20, %v1021_v19  ;;  %v113_v25 = vpack.c.bf16 %v1042_v24, %v1037_v23  ;;  %v276_v26 = vld [vmem:[%s1296_s3] sm:$0xf]  ;;  %v892_v28 = vld [vmem:[%s1297_s5 + $0x8] sm:$0xff]   ;;  %v45_v31 = vld [vmem:[%s1299_s0 + $0x18] sm:$0xff] }
   0x8   :  { %888 = vmatprep.subr.msk.bf16.mxu1 %vm302_vm1, %v276_v26  ;;  %v304_v27 = vsel %vm302_vm1, %v276_v26, 0  ;;  %v893_v29 = vld [vmem:[%s1298_s4 + $0x8] sm:$0xff]   ;;  %v895_v30 = vld [vmem:[%s1298_s4] sm:$0xff]   ;;  %v44_v34 = vld [vmem:[%s1299_s0 + $0x10] sm:$0xff]  ;;  %vm61_vm2 = vcmp.ne.f32.partialorder %v45_v31, 0.0 }
   0x9   :  { %831 = vmatpush3.bf16.msra.mxu1 %v304_v27  ;;  %868 = vmatprep.subr.bf16.mxu0 %v893_v29  ;;  %v42_v32 = vld [vmem:[%s1299_s0] sm:$0xff]  ;;  %v43_v33 = vld [vmem:[%s1299_s0 + $0x8] sm:$0xff]  ;;  %vm60_vm5 = vcmp.ne.f32.partialorder %v44_v34, 0.0  ;;  %v720_v38 = vsel %vm61_vm2, 1.0, %v896_v37  ;;  %v49_v43 = vld [vmem:[%s1299_s0 + $0x38] sm:$0xff] }
   0xa   :  { %815 = vmatmul.mubr.msk.bf16.vlgmr.msra.gmra.mxu0 %vm130_vm0, %v107_v9  ;;  %848 = vmatprep.subr.bf16.mxu1 %v892_v28  ;;  %vm58_vm3 = vcmp.ne.f32.partialorder %v42_v32, 0.0  ;;  %vm59_vm4 = vcmp.ne.f32.partialorder %v43_v33, 0.0  ;;  %v719_v42 = vsel %vm60_vm5, 1.0, %v896_v37  ;;  %v46_v46 = vld [vmem:[%s1299_s0 + $0x20] sm:$0xff]  ;;  %v47_v47 = vld [vmem:[%s1299_s0 + $0x28] sm:$0xff]  ;;  %v48_v50 = vld [vmem:[%s1299_s0 + $0x30] sm:$0xff] }
   0xb   :  { %818 = vmatprep.mubr.msk.bf16.mxu0 %vm130_vm0, %v108_v10  ;;  %869 = vmatpush3.bf16.msra.mxu0 %v893_v29  ;;  %v717_v39 = vsel %vm58_vm3, 1.0, %v896_v37  ;;  %v718_v41 = vsel %vm59_vm4, 1.0, %v896_v37  ;;  %vm65_vm7 = vcmp.ne.f32.partialorder %v49_v43, 0.0  ;;  %vm62_vm8 = vcmp.ne.f32.partialorder %v46_v46, 0.0  ;;  %v894_v56 = vld [vmem:[%s1297_s5] sm:$0xff]   ;;  %v53_v62 = vld [vmem:[%s1299_s0 + $0x58] sm:$0xff] }
   0xc   :  { %870 = vmatprep.subr.bf16.mxu0 %v895_v30  ;;  %vm63_vm9 = vcmp.ne.f32.partialorder %v47_v47, 0.0  ;;  %vm64_vm10 = vcmp.ne.f32.partialorder %v48_v50, 0.0  ;;  %v724_v57 = vsel %vm65_vm7, 1.0, %v896_v37  ;;  %v721_v58 = vsel %vm62_vm8, 1.0, %v896_v37  ;;  %v50_v1 = vld [vmem:[%s1299_s0 + $0x40] sm:$0xff]  ;;  %v57_v32 = vld [vmem:[%s1299_s0 + $0x78] sm:$0xff] }
   0xd   :  { %v722_v60 = vsel %vm63_vm9, 1.0, %v896_v37  ;;  %v723_v61 = vsel %vm64_vm10, 1.0, %v896_v37  ;;  %vm69_vm11 = vcmp.ne.f32.partialorder %v53_v62, 0.0  ;;  %vm66_vm12 = vcmp.ne.f32.partialorder %v50_v1, 0.0 }
   0xe   :  { %v728_v27 = vsel %vm69_vm11, 1.0, %v896_v37  ;;  %vm73_vm15 = vcmp.ne.f32.partialorder %v57_v32, 0.0 }
   0xf   :  { %871 = vmatpush3.bf16.msra.mxu0 %v895_v30  ;;  %v732_v46 = vsel %vm73_vm15, 1.0, %v896_v37 }
  0x12   :  { %819 = vmatmul.mubr.msk.bf16.gmra.mxu0 %vm130_vm0, %v109_v15 }
  0x13   :  { %822 = vmatprep.mubr.msk.bf16.mxu0 %vm130_vm0, %v110_v16 }
  0x1a   :  { %823 = vmatmul.mubr.msk.bf16.gmra.mxu0 %vm130_vm0, %v111_v21 }
  0x1b   :  { %826 = vmatprep.mubr.msk.bf16.mxu0 %vm130_vm0, %v112_v22 }
  0x22   :  { %827 = vmatmul.mubr.msk.bf16.gmra.mxu0 %vm130_vm0, %v113_v25 }
  0x23   :  { %872 = vmatprep.mubr.msk.bf16.mxu0 %vm130_vm0, %v106_v4  ;;  %v51_v4 = vld [vmem:[%s1299_s0 + $0x48] sm:$0xff] }
  0x24   :  { %vm67_vm13 = vcmp.ne.f32.partialorder %v51_v4, 0.0 }
  0x25   :  { %v726_v30 = vsel %vm67_vm13, 1.0, %v896_v37 }
  0x2a   :  { %873 = vmatmul.mubr.msk.bf16.vlgmr.msra.gmra.mxu0 %vm130_vm0, %v107_v9 }
  0x2b   :  { %876 = vmatprep.mubr.msk.bf16.mxu0 %vm130_vm0, %v108_v10 }
  0x32   :  { %877 = vmatmul.mubr.msk.bf16.gmra.mxu0 %vm130_vm0, %v109_v15  ;;  %v52_v15 = vld [vmem:[%s1299_s0 + $0x50] sm:$0xff] }
  0x33   :  { %880 = vmatprep.mubr.msk.bf16.mxu0 %vm130_vm0, %v110_v16  ;;  %vm68_vm14 = vcmp.ne.f32.partialorder %v52_v15, 0.0 }
  0x34   :  { %v727_v31 = vsel %vm68_vm14, 1.0, %v896_v37 }
  0x3a   :  { %881 = vmatmul.mubr.msk.bf16.gmra.mxu0 %vm130_vm0, %v111_v21 }
  0x3b   :  { %884 = vmatprep.mubr.msk.bf16.mxu0 %vm130_vm0, %v112_v22 }
  0x42   :  { %885 = vmatmul.mubr.msk.bf16.gmra.mxu0 %vm130_vm0, %v113_v25 }
  0xca   :  { %v816_v35 = vpop.f32.mrf.mxu0 }
  0xcb   :  { %v254_v51 = vmul.f32 %v816_v35, %v719_v42  ;;  %v54_v35 = vld [vmem:[%s1299_s0 + $0x60] sm:$0xff] }
  0xcc   :  { %v189_v36 = vpop.f32.mrf.mxu0  ;;  %vm70_vm1 = vcmp.ne.f32.partialorder %v54_v35, 0.0 }
  0xcd   :  { %v252_v48 = vmul.f32 %v717_v39, %v189_v36  ;;  %v55_v36 = vld [vmem:[%s1299_s0 + $0x68] sm:$0xff]  ;;  %v729_v47 = vsel %vm70_vm1, 1.0, %v896_v37 }
  0xce   :  { %v817_v40 = vpop.f32.mrf.mxu0  ;;  %vm71_vm2 = vcmp.ne.f32.partialorder %v55_v36, 0.0 }
  0xcf   :  { %v255_v44 = vmul.f32 %v817_v40, %v720_v38  ;;  %v56_v40 = vld [vmem:[%s1299_s0 + $0x70] sm:$0xff] }
  0xd0   :  { %v192_v45 = vpop.f32.mrf.mxu0  ;;  %vm72_vm3 = vcmp.ne.f32.partialorder %v56_v40, 0.0 }
  0xd1   :  { %v253_v49 = vmul.f32 %v718_v41, %v192_v45  ;;  %v269_v54 = vpack.c.bf16 %v255_v44, %v254_v51  ;;  %v731_v50 = vsel %vm72_vm3, 1.0, %v896_v37 }
  0xd2   :  { %v820_v52 = vpop.f32.mrf.mxu0 }
  0xd3   :  { %v268_v53 = vpack.c.bf16 %v253_v49, %v252_v48  ;;  %v258_v16 = vmul.f32 %v820_v52, %v723_v61  ;;  %v730_v49 = vsel %vm71_vm2, 1.0, %v896_v37 }
  0xd4   :  { %v205_v55 = vpop.f32.mrf.mxu0 }
  0xd5   :  { %832 = vmatprep.mubr.msk.bf16.mxu1 %vm277_vm6, %v268_v53  ;;  %v256_v9 = vmul.f32 %v721_v58, %v205_v55 }
  0xd6   :  { %v821_v59 = vpop.f32.mrf.mxu0  ;;  %833 = vmatmul.mubr.msk.bf16.vlgmr.msra.gmra.mxu1 %vm277_vm6, %v269_v54 }
  0xd7   :  { %849 = vmatpush3.bf16.msra.mxu1 %v892_v28  ;;  %v259_v63 = vmul.f32 %v821_v59, %v724_v57  ;;  %v725_v28 = vsel %vm66_vm12, 1.0, %v896_v37 }
  0xd8   :  { %v208_v0 = vpop.f32.mrf.mxu0  ;;  %850 = vmatprep.subr.bf16.mxu1 %v894_v56 }
  0xd9   :  { %v257_v10 = vmul.f32 %v722_v60, %v208_v0  ;;  %v271_v25 = vpack.c.bf16 %v259_v63, %v258_v16 }
  0xda   :  { %v824_v21 = vpop.f32.mrf.mxu0 }
  0xdb   :  { %v270_v22 = vpack.c.bf16 %v257_v10, %v256_v9  ;;  %851 = vmatpush3.bf16.msra.mxu1 %v894_v56  ;;  %v262_v41 = vmul.f32 %v824_v21, %v727_v31 }
  0xdc   :  { %v221_v26 = vpop.f32.mrf.mxu0 }
  0xdd   :  { %836 = vmatprep.mubr.msk.bf16.mxu1 %vm277_vm6, %v270_v22  ;;  %v260_v38 = vmul.f32 %v725_v28, %v221_v26 }
  0xde   :  { %v825_v29 = vpop.f32.mrf.mxu0  ;;  %837 = vmatmul.mubr.msk.bf16.gmra.mxu1 %vm277_vm6, %v271_v25 }
  0xdf   :  { %v263_v33 = vmul.f32 %v825_v29, %v728_v27 }
  0xe0   :  { %v224_v34 = vpop.f32.mrf.mxu0 }
  0xe1   :  { %v261_v39 = vmul.f32 %v726_v30, %v224_v34  ;;  %v273_v44 = vpack.c.bf16 %v263_v33, %v262_v41 }
  0xe2   :  { %v828_v42 = vpop.f32.mrf.mxu0 }
  0xe3   :  { %v272_v43 = vpack.c.bf16 %v261_v39, %v260_v38  ;;  %v266_v55 = vmul.f32 %v828_v42, %v731_v50 }
  0xe4   :  { %v237_v45 = vpop.f32.mrf.mxu0 }
  0xe5   :  { %840 = vmatprep.mubr.msk.bf16.mxu1 %vm277_vm6, %v272_v43  ;;  %v264_v53 = vmul.f32 %v729_v47, %v237_v45 }
  0xe6   :  { %v829_v48 = vpop.f32.mrf.mxu0  ;;  %841 = vmatmul.mubr.msk.bf16.gmra.mxu1 %vm277_vm6, %v273_v44 }
  0xe7   :  { %v267_v51 = vmul.f32 %v829_v48, %v732_v46 }
  0xe8   :  { %v240_v52 = vpop.f32.mrf.mxu0 }
  0xe9   :  { %v265_v54 = vmul.f32 %v730_v49, %v240_v52  ;;  %v275_v57 = vpack.c.bf16 %v267_v51, %v266_v55 }
  0xeb   :  { %v274_v56 = vpack.c.bf16 %v265_v54, %v264_v53 }
  0xed   :  { %844 = vmatprep.mubr.msk.bf16.mxu1 %vm277_vm6, %v274_v56 }
  0xee   :  { %845 = vmatmul.mubr.msk.bf16.gmra.mxu1 %vm277_vm6, %v275_v57 }
 0x196   :  { %v834_v58 = vpop.f32.mrf.mxu1 }
 0x197   :  { %v405_v59 = vadd.f32 %v834_v58, %v958_v5 }
 0x198   :  { %v340_v60 = vpop.f32.mrf.mxu1 }
 0x199   :  { %421 = vst.msk [vmem:[%s1300_s6 + $0x10] sm:$0xff] %vm130_vm0, %v405_v59  ;;  %v403_v37 = vadd.f32 %v340_v60, %v946_v2 }
 0x19a   :  { %v835_v61 = vpop.f32.mrf.mxu1 }
 0x19b   :  { %419 = vst.msk [vmem:[%s1300_s6] sm:$0xff] %vm130_vm0, %v403_v37  ;;  %v406_v62 = vadd.f32 %v835_v61, %v963_v6  ;;  %v440_v1 = vpack.c.bf16 %v835_v61, %v834_v58 }
 0x19c   :  { %v343_v63 = vpop.f32.mrf.mxu1 }
 0x19d   :  { %422 = vst.msk [vmem:[%s1300_s6 + $0x18] sm:$0xff] %vm130_vm0, %v406_v62  ;;  %v404_v5 = vadd.f32 %v343_v63, %v951_v3  ;;  %v439_v0 = vpack.c.bf16 %v343_v63, %v340_v60 }
 0x19e   :  { %v838_v4 = vpop.f32.mrf.mxu1 }
 0x19f   :  { %420 = vst.msk [vmem:[%s1300_s6 + $0x8] sm:$0xff] %vm130_vm0, %v404_v5  ;;  %v409_v2 = vadd.f32 %v838_v4, %v985_v11  ;;  %852 = vmatprep.mubr.msk.bf16.mxu1 %vm130_vm0, %v439_v0 }
 0x1a0   :  { %v356_v6 = vpop.f32.mrf.mxu1  ;;  %853 = vmatmul.mubr.msk.bf16.vlgmr.msra.gmra.mxu1 %vm130_vm0, %v440_v1 }
 0x1a1   :  { %425 = vst.msk [vmem:[%s1300_s6 + $0x30] sm:$0xff] %vm130_vm0, %v409_v2  ;;  %v407_v3 = vadd.f32 %v356_v6, %v968_v7 }
 0x1a2   :  { %v839_v9 = vpop.f32.mrf.mxu1 }
 0x1a3   :  { %423 = vst.msk [vmem:[%s1300_s6 + $0x20] sm:$0xff] %vm130_vm0, %v407_v3  ;;  %v410_v11 = vadd.f32 %v839_v9, %v990_v12  ;;  %v442_v21 = vpack.c.bf16 %v839_v9, %v838_v4 }
 0x1a4   :  { %v359_v10 = vpop.f32.mrf.mxu1 }
 0x1a5   :  { %426 = vst.msk [vmem:[%s1300_s6 + $0x38] sm:$0xff] %vm130_vm0, %v410_v11  ;;  %v408_v15 = vadd.f32 %v359_v10, %v973_v8  ;;  %v441_v16 = vpack.c.bf16 %v359_v10, %v356_v6 }
 0x1a6   :  { %v842_v22 = vpop.f32.mrf.mxu1 }
 0x1a7   :  { %424 = vst.msk [vmem:[%s1300_s6 + $0x28] sm:$0xff] %vm130_vm0, %v408_v15  ;;  %v413_v7 = vadd.f32 %v842_v22, %v1011_v17  ;;  %856 = vmatprep.mubr.msk.bf16.mxu1 %vm130_vm0, %v441_v16 }
 0x1a8   :  { %v372_v12 = vpop.f32.mrf.mxu1  ;;  %857 = vmatmul.mubr.msk.bf16.gmra.mxu1 %vm130_vm0, %v442_v21 }
 0x1a9   :  { %429 = vst.msk [vmem:[%s1300_s6 + $0x50] sm:$0xff] %vm130_vm0, %v413_v7  ;;  %v411_v8 = vadd.f32 %v372_v12, %v995_v13 }
 0x1aa   :  { %v843_v25 = vpop.f32.mrf.mxu1 }
 0x1ab   :  { %427 = vst.msk [vmem:[%s1300_s6 + $0x40] sm:$0xff] %vm130_vm0, %v411_v8  ;;  %v414_v17 = vadd.f32 %v843_v25, %v1016_v18  ;;  %v444_v29 = vpack.c.bf16 %v843_v25, %v842_v22 }
 0x1ac   :  { %v375_v26 = vpop.f32.mrf.mxu1 }
 0x1ad   :  { %430 = vst.msk [vmem:[%s1300_s6 + $0x58] sm:$0xff] %vm130_vm0, %v414_v17  ;;  %v412_v27 = vadd.f32 %v375_v26, %v1000_v14  ;;  %v443_v28 = vpack.c.bf16 %v375_v26, %v372_v12 }
 0x1ae   :  { %v846_v30 = vpop.f32.mrf.mxu1 }
 0x1af   :  { %428 = vst.msk [vmem:[%s1300_s6 + $0x48] sm:$0xff] %vm130_vm0, %v412_v27  ;;  %v417_v13 = vadd.f32 %v846_v30, %v1037_v23  ;;  %860 = vmatprep.mubr.msk.bf16.mxu1 %vm130_vm0, %v443_v28 }
 0x1b0   :  { %v388_v18 = vpop.f32.mrf.mxu1  ;;  %861 = vmatmul.mubr.msk.bf16.gmra.mxu1 %vm130_vm0, %v444_v29 }
 0x1b1   :  { %433 = vst.msk [vmem:[%s1300_s6 + $0x70] sm:$0xff] %vm130_vm0, %v417_v13  ;;  %v415_v14 = vadd.f32 %v388_v18, %v1021_v19  ;;  %v874_v19 = vpop.f32.mrf.mxu0 }
 0x1b2   :  { %v847_v31 = vpop.f32.mrf.mxu1 }
 0x1b3   :  { %431 = vst.msk [vmem:[%s1300_s6 + $0x60] sm:$0xff] %vm130_vm0, %v415_v14  ;;  %v418_v23 = vadd.f32 %v847_v31, %v1042_v24  ;;  %v446_v35 = vpack.c.bf16 %v847_v31, %v846_v30  ;;  %v630_v24 = vpop.f32.mrf.mxu0 }
 0x1b4   :  { %v391_v32 = vpop.f32.mrf.mxu1 }
 0x1b5   :  { %434 = vst.msk [vmem:[%s1300_s6 + $0x78] sm:$0xff] %vm130_vm0, %v418_v23  ;;  %v416_v33 = vadd.f32 %v391_v32, %v1026_v20  ;;  %v445_v34 = vpack.c.bf16 %v391_v32, %v388_v18  ;;  %v875_v36 = vpop.f32.mrf.mxu0 }
 0x1b7   :  { %432 = vst.msk [vmem:[%s1300_s6 + $0x68] sm:$0xff] %vm130_vm0, %v416_v33  ;;  %864 = vmatprep.mubr.msk.bf16.mxu1 %vm130_vm0, %v445_v34  ;;  %v633_v38 = vpop.f32.mrf.mxu0 }
 0x1b8   :  { %865 = vmatmul.mubr.msk.bf16.gmra.mxu1 %vm130_vm0, %v446_v35 }
 0x1b9   :  { %v878_v39 = vpop.f32.mrf.mxu0 }
 0x1bb   :  { %v646_v40 = vpop.f32.mrf.mxu0 }
 0x1bd   :  { %v879_v41 = vpop.f32.mrf.mxu0 }
 0x1bf   :  { %v649_v42 = vpop.f32.mrf.mxu0 }
 0x1c1   :  { %v882_v45 = vpop.f32.mrf.mxu0 }
 0x1c3   :  { %v662_v50 = vpop.f32.mrf.mxu0 }
 0x1c5   :  { %v883_v55 = vpop.f32.mrf.mxu0 }
 0x1c7   :  { %v665_v60 = vpop.f32.mrf.mxu0 }
 0x1c9   :  { %v886_v5 = vpop.f32.mrf.mxu0 }
 0x1cb   :  { %v678_v2 = vpop.f32.mrf.mxu0 }
 0x1cd   :  { %v887_v10 = vpop.f32.mrf.mxu0 }
 0x1cf   :  { %v681_v7 = vpop.f32.mrf.mxu0 }
 0x260   :  { %v854_v20 = vpop.f32.mrf.mxu1 }
 0x261   :  { %v639_v43 = vadd.f32 %v874_v19, %v854_v20 }
 0x262   :  { %v521_v44 = vpop.f32.mrf.mxu1 }
 0x263   :  { %695 = vst.msk [vmem:[%s1301_s7 + $0x10] sm:$0xff] %vm130_vm0, %v639_v43  ;;  %v631_v46 = vadd.f32 %v630_v24, %v521_v44 }
 0x264   :  { %v855_v47 = vpop.f32.mrf.mxu1 }
 0x265   :  { %693 = vst.msk [vmem:[%s1301_s7] sm:$0xff] %vm130_vm0, %v631_v46  ;;  %v642_v48 = vadd.f32 %v875_v36, %v855_v47 }
 0x266   :  { %v524_v49 = vpop.f32.mrf.mxu1 }
 0x267   :  { %696 = vst.msk [vmem:[%s1301_s7 + $0x18] sm:$0xff] %vm130_vm0, %v642_v48  ;;  %v634_v51 = vadd.f32 %v633_v38, %v524_v49 }
 0x268   :  { %v858_v52 = vpop.f32.mrf.mxu1 }
 0x269   :  { %694 = vst.msk [vmem:[%s1301_s7 + $0x8] sm:$0xff] %vm130_vm0, %v634_v51  ;;  %v655_v53 = vadd.f32 %v878_v39, %v858_v52 }
 0x26a   :  { %v537_v54 = vpop.f32.mrf.mxu1 }
 0x26b   :  { %699 = vst.msk [vmem:[%s1301_s7 + $0x30] sm:$0xff] %vm130_vm0, %v655_v53  ;;  %v647_v56 = vadd.f32 %v646_v40, %v537_v54 }
 0x26c   :  { %v859_v57 = vpop.f32.mrf.mxu1 }
 0x26d   :  { %697 = vst.msk [vmem:[%s1301_s7 + $0x20] sm:$0xff] %vm130_vm0, %v647_v56  ;;  %v658_v58 = vadd.f32 %v879_v41, %v859_v57 }
 0x26e   :  { %v540_v59 = vpop.f32.mrf.mxu1 }
 0x26f   :  { %700 = vst.msk [vmem:[%s1301_s7 + $0x38] sm:$0xff] %vm130_vm0, %v658_v58  ;;  %v650_v37 = vadd.f32 %v649_v42, %v540_v59 }
 0x270   :  { %v862_v61 = vpop.f32.mrf.mxu1 }
 0x271   :  { %698 = vst.msk [vmem:[%s1301_s7 + $0x28] sm:$0xff] %vm130_vm0, %v650_v37  ;;  %v671_v62 = vadd.f32 %v882_v45, %v862_v61 }
 0x272   :  { %v553_v63 = vpop.f32.mrf.mxu1 }
 0x273   :  { %703 = vst.msk [vmem:[%s1301_s7 + $0x50] sm:$0xff] %vm130_vm0, %v671_v62  ;;  %v663_v0 = vadd.f32 %v662_v50, %v553_v63 }
 0x274   :  { %v863_v1 = vpop.f32.mrf.mxu1 }
 0x275   :  { %701 = vst.msk [vmem:[%s1301_s7 + $0x40] sm:$0xff] %vm130_vm0, %v663_v0  ;;  %v674_v4 = vadd.f32 %v883_v55, %v863_v1 }
 0x276   :  { %v556_v6 = vpop.f32.mrf.mxu1 }
 0x277   :  { %704 = vst.msk [vmem:[%s1301_s7 + $0x58] sm:$0xff] %vm130_vm0, %v674_v4  ;;  %v666_v3 = vadd.f32 %v665_v60, %v556_v6 }
 0x278   :  { %v866_v9 = vpop.f32.mrf.mxu1 }
 0x279   :  { %702 = vst.msk [vmem:[%s1301_s7 + $0x48] sm:$0xff] %vm130_vm0, %v666_v3  ;;  %v687_v11 = vadd.f32 %v886_v5, %v866_v9 }
 0x27a   :  { %v569_v15 = vpop.f32.mrf.mxu1 }
 0x27b   :  { %707 = vst.msk [vmem:[%s1301_s7 + $0x70] sm:$0xff] %vm130_vm0, %v687_v11  ;;  %v679_v16 = vadd.f32 %v678_v2, %v569_v15 }
 0x27c   :  { %v867_v21 = vpop.f32.mrf.mxu1 }
 0x27d   :  { %705 = vst.msk [vmem:[%s1301_s7 + $0x60] sm:$0xff] %vm130_vm0, %v679_v16  ;;  %v690_v22 = vadd.f32 %v887_v10, %v867_v21 }
 0x27e   :  { %v572_v12 = vpop.f32.mrf.mxu1 }
 0x27f   :  { %708 = vst.msk [vmem:[%s1301_s7 + $0x78] sm:$0xff] %vm130_vm0, %v690_v22  ;;  %v682_v8 = vadd.f32 %v681_v7, %v572_v12 }
 0x281   :  { %706 = vst.msk [vmem:[%s1301_s7 + $0x68] sm:$0xff] %vm130_vm0, %v682_v8 }

</bundles_post_ra>
